<compile_context>
chip_gen: v7x
topology: tpu7x:2x2x1
jax: 0.10.0
libtpu: 0.0.40
codegen_flags: <defaults>
</compile_context>

<pallas_src>
import functools

import jax
import jax.numpy as jnp
from jax.experimental import pallas as pl
from jax.experimental.pallas import tpu as pltpu

NUM_CLASSES = 10
PADDED_CLASSES = 128          # lane-dense logits / output width
HIDDEN_PAD = 128              # fc3 output (64) padded to a full lane block
NEG_SENTINEL = -1.0e30        # finite "-inf" baked into padded fc4 bias cols
DIMS = (784, 256, 128, 64, NUM_CLASSES)


def _round_up(n, m):
    return ((n + m - 1) // m) * m


def fmnist_mlp_kernel(x_ref,
                      w1_ref, b1_ref,
                      w2_ref, b2_ref,
                      w3_ref, b3_ref,
                      w4_ref, b4_ref,
                      o_ref):
    """One batch tile: 4 matmuls (bf16 x bf16 -> f32 acc) + ReLU + log_softmax."""
    # In-kernel bf16 cast (input arrives as f32 straight from HBM).
    x = x_ref[...].astype(jnp.bfloat16)                                # (TB, 784)

    # fc1 + ReLU   (dropout == identity in eval mode)
    h = jnp.dot(x, w1_ref[...], preferred_element_type=jnp.float32) + b1_ref[...]
    h = jnp.maximum(h, 0.0).astype(jnp.bfloat16)                       # (TB, 256)

    # fc2 + ReLU
    h = jnp.dot(h, w2_ref[...], preferred_element_type=jnp.float32) + b2_ref[...]
    h = jnp.maximum(h, 0.0).astype(jnp.bfloat16)                       # (TB, 128)

    # fc3 + ReLU (output padded 64 -> 128; padded cols are exactly 0)
    h = jnp.dot(h, w3_ref[...], preferred_element_type=jnp.float32) + b3_ref[...]
    h = jnp.maximum(h, 0.0).astype(jnp.bfloat16)                       # (TB, 128)

    # fc4 logits, padded to 128 lanes. Padded columns carry bias = -1e30, so
    # max / exp ignore them naturally (no iota / where needed).
    logits = jnp.dot(h, w4_ref[...], preferred_element_type=jnp.float32) + b4_ref[...]

    m = jnp.max(logits, axis=1, keepdims=True)
    shifted = logits - m
    lse = jnp.log(jnp.sum(jnp.exp(shifted), axis=1, keepdims=True))
    o_ref[...] = (shifted - lse).astype(o_ref.dtype)   # cols >= 10 are junk, sliced off


def prepare_params(params):
    """One-time weight preprocessing (bf16 casts + lane padding), outside the hot path.

    PyTorch stores Linear weight as (out, in); we keep the transposed (in, out)
    layout so the kernel computes x @ W + b directly. Biases stay f32 and 2-D.
    """
    (w1, b1), (w2, b2), (w3, b3), (w4, b4) = params

    w1 = w1.astype(jnp.bfloat16)                                        # (784, 256)
    w2 = w2.astype(jnp.bfloat16)                                        # (256, 128)

    # fc3: pad output 64 -> 128 with zeros (ReLU(0 + 0) == 0).
    w3p = jnp.zeros((DIMS[2], HIDDEN_PAD), jnp.bfloat16).at[:, :DIMS[3]].set(
        w3.astype(jnp.bfloat16))                                        # (128, 128)
    b3p = jnp.zeros((1, HIDDEN_PAD), jnp.float32).at[:, :DIMS[3]].set(b3)

    # fc4: pad input 64 -> 128 (zero rows) and output 10 -> 128 (zero cols);
    # bake a finite -1e30 into the padded bias columns for the softmax mask.
    w4p = jnp.zeros((HIDDEN_PAD, PADDED_CLASSES), jnp.bfloat16).at[
        :DIMS[3], :NUM_CLASSES].set(w4.astype(jnp.bfloat16))            # (128, 128)
    b4p = jnp.full((1, PADDED_CLASSES), NEG_SENTINEL, jnp.float32).at[
        :, :NUM_CLASSES].set(b4)

    return (w1, b1, w2, b2, w3p, b3p, w4p, b4p)


@functools.partial(jax.jit, static_argnames=("tile_b",))
def fmnist_forward(x_nchw, prepped, tile_b=1024):
    """x_nchw: (B, 1, 28, 28) float32 -> (B, 10) float32 log-probabilities."""
    b = x_nchw.shape[0]
    x = x_nchw.reshape(b, -1)                 # (B, 784) f32; bf16 cast is in-kernel

    w1, b1, w2, b2, w3p, b3p, w4p, b4p = prepped

    # Tile: multiple of 8 sublanes; capped so the grid keeps >= 2 steps when
    # the batch allows it (lets the "parallel" axis shard across v7x's 2 TCs).
    tb = max(8, min(tile_b, _round_up(pl.cdiv(b, 2), 8)))
    tb = _round_up(tb, 8)
    grid = (pl.cdiv(b, tb),)                  # ragged last block: OOB stores dropped

    batch_map = lambda i: (i, 0)
    const_map = lambda i: (0, 0)

    in_specs = [
        pl.BlockSpec((tb, DIMS[0]), batch_map),                  # x tile (pipelined)
        pl.BlockSpec(w1.shape, const_map), pl.BlockSpec(b1.shape, const_map),
        pl.BlockSpec(w2.shape, const_map), pl.BlockSpec(b2.shape, const_map),
        pl.BlockSpec(w3p.shape, const_map), pl.BlockSpec(b3p.shape, const_map),
        pl.BlockSpec(w4p.shape, const_map), pl.BlockSpec(b4p.shape, const_map),
    ]
    out_specs = pl.BlockSpec((tb, PADDED_CLASSES), batch_map)

    out_padded = pl.pallas_call(
        fmnist_mlp_kernel,
        out_shape=jax.ShapeDtypeStruct((b, PADDED_CLASSES), jnp.bfloat16),
        grid_spec=pltpu.PrefetchScalarGridSpec(
            num_scalar_prefetch=0,
            grid=grid,
            in_specs=in_specs,
            out_specs=out_specs,
        ),
        compiler_params=pltpu.CompilerParams(
            dimension_semantics=("parallel",),    # independent batch tiles
            vmem_limit_bytes=32 << 20,            # fits v5e/v6e/v7x with headroom
        ),
    )(x, w1, b1, w2, b2, w3p, b3p, w4p, b4p)

    return out_padded[:, :NUM_CLASSES].astype(jnp.float32)


def init_params(key):
    """Deterministic synthetic parameters matching nn.Linear shapes ((in, out) layout)."""
    params = []
    for i in range(4):
        key, kw, kb = jax.random.split(key, 3)
        fan_in, fan_out = DIMS[i], DIMS[i + 1]
        bound = 1.0 / jnp.sqrt(fan_in)
        w = jax.random.uniform(kw, (fan_in, fan_out), jnp.float32, -bound, bound)
        bias = jax.random.uniform(kb, (1, fan_out), jnp.float32, -bound, bound)
        params.append((w, bias))
    return params


def reference_forward(x_nchw, params):
    """Pure-JAX f32 reference for correctness checking."""
    x = x_nchw.reshape(x_nchw.shape[0], -1)
    (w1, b1), (w2, b2), (w3, b3), (w4, b4) = params
    h = jnp.maximum(x @ w1 + b1, 0.0)
    h = jnp.maximum(h @ w2 + b2, 0.0)
    h = jnp.maximum(h @ w3 + b3, 0.0)
    logits = h @ w4 + b4
    return jax.nn.log_softmax(logits, axis=1)


if __name__ == "__main__":
    key = jax.random.PRNGKey(0)
    key, kx = jax.random.split(key)

    batch = 20                                           # not a multiple of the tile: tests ragged last block
    x = jax.random.normal(kx, (batch, 1, 28, 28), jnp.float32)

    params = init_params(key)
    prepped = prepare_params(params)                     # one-time weight padding / bf16 cast

    # Small tile for the demo (multi-step grid: cdiv(20, 8) = 3, last block ragged).
    out = fmnist_forward(x, prepped, tile_b=8)
    out = jax.block_until_ready(out)

    ref = reference_forward(x, params)
    assert out.shape == (batch, NUM_CLASSES)
    assert bool(jnp.all(jnp.isfinite(out)))
    # bf16 matmuls + bf16 output store vs f32 reference -> loose tolerance.
    assert jnp.allclose(out, ref, atol=2e-2, rtol=2e-2), "Pallas output mismatch vs reference"

    print("KERNEL_OK")
</pallas_src>

<mosaic_0001>
module attributes {stable_mosaic.version = 11 : i64} {
  func.func @fmnist_mlp_kernel(%arg0: i32, %arg1: memref<8x784xf32, #tpu.memory_space<vmem>>, %arg2: memref<784x256xbf16, #tpu.memory_space<vmem>>, %arg3: memref<1x256xf32, #tpu.memory_space<vmem>>, %arg4: memref<256x128xbf16, #tpu.memory_space<vmem>>, %arg5: memref<1x128xf32, #tpu.memory_space<vmem>>, %arg6: memref<128x128xbf16, #tpu.memory_space<vmem>>, %arg7: memref<1x128xf32, #tpu.memory_space<vmem>>, %arg8: memref<128x128xbf16, #tpu.memory_space<vmem>>, %arg9: memref<1x128xf32, #tpu.memory_space<vmem>>, %arg10: memref<8x128xbf16, #tpu.memory_space<vmem>>) attributes {dimension_semantics = [#tpu.dimension_semantics<parallel>], iteration_bounds = array<i64: 3>, scalar_prefetch = 0 : i64, scratch_operands = 0 : i64, tpu.core_type = #tpu.core_type<tc>, window_params = [{transform_indices = @transform_0, window_bounds = array<i64: 8, 784>}, {pipeline_mode = #tpu.pipeline_mode<synchronous>, transform_indices = @transform_1, window_bounds = array<i64: 784, 256>}, {pipeline_mode = #tpu.pipeline_mode<synchronous>, transform_indices = @transform_2, window_bounds = array<i64: 1, 256>}, {pipeline_mode = #tpu.pipeline_mode<synchronous>, transform_indices = @transform_3, window_bounds = array<i64: 256, 128>}, {pipeline_mode = #tpu.pipeline_mode<synchronous>, transform_indices = @transform_4, window_bounds = array<i64: 1, 128>}, {pipeline_mode = #tpu.pipeline_mode<synchronous>, transform_indices = @transform_5, window_bounds = array<i64: 128, 128>}, {pipeline_mode = #tpu.pipeline_mode<synchronous>, transform_indices = @transform_6, window_bounds = array<i64: 1, 128>}, {pipeline_mode = #tpu.pipeline_mode<synchronous>, transform_indices = @transform_7, window_bounds = array<i64: 128, 128>}, {pipeline_mode = #tpu.pipeline_mode<synchronous>, transform_indices = @transform_8, window_bounds = array<i64: 1, 128>}, {transform_indices = @transform_9, window_bounds = array<i64: 8, 128>}]} {
    %c0 = arith.constant 0 : index
    %c0_0 = arith.constant 0 : index
    %0 = vector.load %arg1[%c0, %c0_0] : memref<8x784xf32, #tpu.memory_space<vmem>>, vector<8x784xf32>
    %1 = arith.truncf %0 : vector<8x784xf32> to vector<8x784xbf16>
    %c0_1 = arith.constant 0 : index
    %c0_2 = arith.constant 0 : index
    %2 = vector.load %arg2[%c0_1, %c0_2] : memref<784x256xbf16, #tpu.memory_space<vmem>>, vector<784x256xbf16>
    %cst = arith.constant dense<0.000000e+00> : vector<8x256xf32>
    %3 = tpu.matmul %1, %2, %cst {dimension_numbers = #tpu.dot_dimension_numbers<[1], [0], [0], [1], [0, 0, 1, 1], [], []>} : vector<8x784xbf16>, vector<784x256xbf16>, vector<8x256xf32> -> vector<8x256xf32>
    %c0_3 = arith.constant 0 : index
    %c0_4 = arith.constant 0 : index
    %4 = vector.load %arg3[%c0_3, %c0_4] : memref<1x256xf32, #tpu.memory_space<vmem>>, vector<1x256xf32>
    %5 = vector.broadcast %4 : vector<1x256xf32> to vector<8x256xf32>
    %6 = arith.addf %3, %5 : vector<8x256xf32>
    %cst_5 = arith.constant 0.000000e+00 : f32
    %7 = vector.broadcast %cst_5 : f32 to vector<8x256xf32>
    %8 = arith.maximumf %6, %7 : vector<8x256xf32>
    %9 = arith.truncf %8 : vector<8x256xf32> to vector<8x256xbf16>
    %c0_6 = arith.constant 0 : index
    %c0_7 = arith.constant 0 : index
    %10 = vector.load %arg4[%c0_6, %c0_7] : memref<256x128xbf16, #tpu.memory_space<vmem>>, vector<256x128xbf16>
    %cst_8 = arith.constant dense<0.000000e+00> : vector<8x128xf32>
    %11 = tpu.matmul %9, %10, %cst_8 {dimension_numbers = #tpu.dot_dimension_numbers<[1], [0], [0], [1], [0, 0, 1, 1], [], []>} : vector<8x256xbf16>, vector<256x128xbf16>, vector<8x128xf32> -> vector<8x128xf32>
    %c0_9 = arith.constant 0 : index
    %c0_10 = arith.constant 0 : index
    %12 = vector.load %arg5[%c0_9, %c0_10] : memref<1x128xf32, #tpu.memory_space<vmem>>, vector<1x128xf32>
    %13 = vector.broadcast %12 : vector<1x128xf32> to vector<8x128xf32>
    %14 = arith.addf %11, %13 : vector<8x128xf32>
    %cst_11 = arith.constant 0.000000e+00 : f32
    %15 = vector.broadcast %cst_11 : f32 to vector<8x128xf32>
    %16 = arith.maximumf %14, %15 : vector<8x128xf32>
    %17 = arith.truncf %16 : vector<8x128xf32> to vector<8x128xbf16>
    %c0_12 = arith.constant 0 : index
    %c0_13 = arith.constant 0 : index
    %18 = vector.load %arg6[%c0_12, %c0_13] : memref<128x128xbf16, #tpu.memory_space<vmem>>, vector<128x128xbf16>
    %cst_14 = arith.constant dense<0.000000e+00> : vector<8x128xf32>
    %19 = tpu.matmul %17, %18, %cst_14 {dimension_numbers = #tpu.dot_dimension_numbers<[1], [0], [0], [1], [0, 0, 1, 1], [], []>} : vector<8x128xbf16>, vector<128x128xbf16>, vector<8x128xf32> -> vector<8x128xf32>
    %c0_15 = arith.constant 0 : index
    %c0_16 = arith.constant 0 : index
    %20 = vector.load %arg7[%c0_15, %c0_16] : memref<1x128xf32, #tpu.memory_space<vmem>>, vector<1x128xf32>
    %21 = vector.broadcast %20 : vector<1x128xf32> to vector<8x128xf32>
    %22 = arith.addf %19, %21 : vector<8x128xf32>
    %cst_17 = arith.constant 0.000000e+00 : f32
    %23 = vector.broadcast %cst_17 : f32 to vector<8x128xf32>
    %24 = arith.maximumf %22, %23 : vector<8x128xf32>
    %25 = arith.truncf %24 : vector<8x128xf32> to vector<8x128xbf16>
    %c0_18 = arith.constant 0 : index
    %c0_19 = arith.constant 0 : index
    %26 = vector.load %arg8[%c0_18, %c0_19] : memref<128x128xbf16, #tpu.memory_space<vmem>>, vector<128x128xbf16>
    %cst_20 = arith.constant dense<0.000000e+00> : vector<8x128xf32>
    %27 = tpu.matmul %25, %26, %cst_20 {dimension_numbers = #tpu.dot_dimension_numbers<[1], [0], [0], [1], [0, 0, 1, 1], [], []>} : vector<8x128xbf16>, vector<128x128xbf16>, vector<8x128xf32> -> vector<8x128xf32>
    %c0_21 = arith.constant 0 : index
    %c0_22 = arith.constant 0 : index
    %28 = vector.load %arg9[%c0_21, %c0_22] : memref<1x128xf32, #tpu.memory_space<vmem>>, vector<1x128xf32>
    %29 = vector.broadcast %28 : vector<1x128xf32> to vector<8x128xf32>
    %30 = arith.addf %27, %29 : vector<8x128xf32>
    %cst_23 = arith.constant dense<0xFF800000> : vector<8xf32>
    %31 = vector.multi_reduction <maximumf>, %30, %cst_23 [1] : vector<8x128xf32> to vector<8xf32>
    %32 = vector.shape_cast %31 : vector<8xf32> to vector<8x1xf32>
    %33 = vector.broadcast %32 : vector<8x1xf32> to vector<8x128xf32>
    %34 = arith.subf %30, %33 : vector<8x128xf32>
    %35 = math.exp %34 : vector<8x128xf32>
    %cst_24 = arith.constant dense<0.000000e+00> : vector<8xf32>
    %36 = vector.multi_reduction <add>, %35, %cst_24 [1] : vector<8x128xf32> to vector<8xf32>
    %37 = vector.shape_cast %36 : vector<8xf32> to vector<8x1xf32>
    %38 = math.log %37 : vector<8x1xf32>
    %39 = vector.broadcast %38 : vector<8x1xf32> to vector<8x128xf32>
    %40 = arith.subf %34, %39 : vector<8x128xf32>
    %41 = arith.truncf %40 : vector<8x128xf32> to vector<8x128xbf16>
    %c0_25 = arith.constant 0 : index
    %c0_26 = arith.constant 0 : index
    %42 = vector.load %arg10[%c0_25, %c0_26] : memref<8x128xbf16, #tpu.memory_space<vmem>>, vector<8x128xbf16>
    tpu.vector_store %arg10[%c0_25, %c0_26], %41 {strides = array<i32>} : memref<8x128xbf16, #tpu.memory_space<vmem>>, vector<8x128xbf16>,
    return
  }
  func.func @transform_0(%arg0: i32) -> (i32, i32) {
    %c0_i32 = arith.constant 0 : i32
    %c0_i32_0 = arith.constant 0 : i32
    return %arg0, %c0_i32 : i32, i32
  }
  func.func @transform_1(%arg0: i32) -> (i32, i32) {
    %c0_i32 = arith.constant 0 : i32
    %c0_i32_0 = arith.constant 0 : i32
    %c0_i32_1 = arith.constant 0 : i32
    return %c0_i32, %c0_i32_0 : i32, i32
  }
  func.func @transform_2(%arg0: i32) -> (i32, i32) {
    %c0_i32 = arith.constant 0 : i32
    %c0_i32_0 = arith.constant 0 : i32
    %c0_i32_1 = arith.constant 0 : i32
    return %c0_i32, %c0_i32_0 : i32, i32
  }
  func.func @transform_3(%arg0: i32) -> (i32, i32) {
    %c0_i32 = arith.constant 0 : i32
    %c0_i32_0 = arith.constant 0 : i32
    %c0_i32_1 = arith.constant 0 : i32
    return %c0_i32, %c0_i32_0 : i32, i32
  }
  func.func @transform_4(%arg0: i32) -> (i32, i32) {
    %c0_i32 = arith.constant 0 : i32
    %c0_i32_0 = arith.constant 0 : i32
    %c0_i32_1 = arith.constant 0 : i32
    return %c0_i32, %c0_i32_0 : i32, i32
  }
  func.func @transform_5(%arg0: i32) -> (i32, i32) {
    %c0_i32 = arith.constant 0 : i32
    %c0_i32_0 = arith.constant 0 : i32
    %c0_i32_1 = arith.constant 0 : i32
    return %c0_i32, %c0_i32_0 : i32, i32
  }
  func.func @transform_6(%arg0: i32) -> (i32, i32) {
    %c0_i32 = arith.constant 0 : i32
    %c0_i32_0 = arith.constant 0 : i32
    %c0_i32_1 = arith.constant 0 : i32
    return %c0_i32, %c0_i32_0 : i32, i32
  }
  func.func @transform_7(%arg0: i32) -> (i32, i32) {
    %c0_i32 = arith.constant 0 : i32
    %c0_i32_0 = arith.constant 0 : i32
    %c0_i32_1 = arith.constant 0 : i32
    return %c0_i32, %c0_i32_0 : i32, i32
  }
  func.func @transform_8(%arg0: i32) -> (i32, i32) {
    %c0_i32 = arith.constant 0 : i32
    %c0_i32_0 = arith.constant 0 : i32
    %c0_i32_1 = arith.constant 0 : i32
    return %c0_i32, %c0_i32_0 : i32, i32
  }
  func.func @transform_9(%arg0: i32) -> (i32, i32) {
    %c0_i32 = arith.constant 0 : i32
    %c0_i32_0 = arith.constant 0 : i32
    return %arg0, %c0_i32 : i32, i32
  }
}

</mosaic_0001>

<bundles_post_ra>
// kernel: fmnist_forward.1
= control target key start
LH: loop header
LB: loop body
LE: loop exit
PB: predicated region body
PF: predicated region fallthrough
CT: control target
= control target key end

     0   :  { %s2075_s30 = smov 0   ;;  %s2525_s0 = inlined_call_operand.vmem [shape: f32[20,784], index: 0, kind: input, shape index: {}]   ;;  %s2526_s1 = inlined_call_operand.vmem [shape: bf16[784,256], index: 1, kind: input, shape index: {}]   ;;  %s2527_s2 = inlined_call_operand.vmem [shape: f32[1,256], index: 2, kind: input, shape index: {}]   ;;  %s2528_s3 = inlined_call_operand.vmem [shape: bf16[256,128], index: 3, kind: input, shape index: {}]   ;;  %s2529_s4 = inlined_call_operand.vmem [shape: f32[1,128], index: 4, kind: input, shape index: {}]   ;;  %s2530_s5 = inlined_call_operand.vmem [shape: bf16[128,128], index: 5, kind: input, shape index: {}]   ;;  %s2531_s6 = inlined_call_operand.vmem [shape: f32[1,128], index: 6, kind: input, shape index: {}]   ;;  %s2532_s7 = inlined_call_operand.vmem [shape: bf16[128,128], index: 7, kind: input, shape index: {}]   ;;  %s2533_s8 = inlined_call_operand.vmem [shape: f32[1,128], index: 8, kind: input, shape index: {}]   ;;  %s2534_s9 = inlined_call_operand.vmem [shape: bf16[20,128], index: 9, kind: output, shape index: {}]  }
   0x1 LB: > { %s1584_s10 = sadd.s32 4294967295, %s2020_s30   ;;  %p1588_p0 = scmp.ge.s32.totalorder %s2020_s30, 1  ;;  %s2020_s30 = sphi %s2075_s30, %s19_s30  }
   0x2   : > { %p287_p1 = scmp.lt.s32.totalorder %s2020_s30, 4 }
   0x4   : > { %p288_p2 = pnand %p1588_p0, %p287_p1 }
   0x5   : > { %v1831_v0 = vld [vmem:[%s2526_s1 + $0x104] ss:$8 sps:$4 sm:$0xff] (!%p288_p2)   ;;  %v1833_v1 = vld [vmem:[%s2526_s1 + $0x100] ss:$8 sps:$4 sm:$0xff] (!%p288_p2)   ;;  %v1834_v2 = vld [vmem:[%s2526_s1 + $0x114] ss:$8 sps:$4 sm:$0xff] (!%p288_p2)  }
   0x6   : > { %291 = sbr.rel (%p288_p2) target bundleno = 1336 (0x538), region = 56  ;;  %991 = vmatprep.subr.bf16.mxu0 (!%p288_p2), %v1831_v0  ;;  %v1836_v3 = vld [vmem:[%s2526_s1 + $0x110] ss:$8 sps:$4 sm:$0xff] (!%p288_p2)   ;;  %v1837_v4 = vld [vmem:[%s2526_s1 + $0x124] ss:$8 sps:$4 sm:$0xff] (!%p288_p2)   ;;  %p322_p3 = scmp.lt.s32.totalorder (!%p288_p2), %s1584_s10, 2 }
   0x7   : > { %992 = vmatpush1.bf16.msra.mxu0 (!%p288_p2), %v1833_v1  ;;  %v1839_v5 = vld [vmem:[%s2526_s1 + $0x120] ss:$8 sps:$4 sm:$0xff] (!%p288_p2)   ;;  %v1840_v6 = vld [vmem:[%s2526_s1 + $0x134] ss:$8 sps:$4 sm:$0xff] (!%p288_p2)   ;;  %v1842_v7 = vld [vmem:[%s2526_s1 + $0x130] ss:$8 sps:$4 sm:$0xff] (!%p288_p2)  }
   0x8   : > { %993 = vmatprep.subr.bf16.mxu0 (!%p288_p2), %v1834_v2  ;;  %v1843_v8 = vld [vmem:[%s2526_s1 + $0x144] ss:$8 sps:$4 sm:$0xff] (!%p288_p2)   ;;  %v1845_v9 = vld [vmem:[%s2526_s1 + $0x140] ss:$8 sps:$4 sm:$0xff] (!%p288_p2)   ;;  %v1846_v10 = vld [vmem:[%s2526_s1 + $0x154] ss:$8 sps:$4 sm:$0xff] (!%p288_p2)  }
   0x9   : > { %v1848_v11 = vld [vmem:[%s2526_s1 + $0x150] ss:$8 sps:$4 sm:$0xff] (!%p288_p2)   ;;  %v1849_v12 = vld [vmem:[%s2526_s1 + $0x164] ss:$8 sps:$4 sm:$0xff] (!%p288_p2)   ;;  %v1851_v15 = vld [vmem:[%s2526_s1 + $0x160] ss:$8 sps:$4 sm:$0xff] (!%p288_p2)  }
   0xa   : > { %v1852_v16 = vld [vmem:[%s2526_s1 + $0x174] ss:$8 sps:$4 sm:$0xff] (!%p288_p2)   ;;  %v1885_v17 = vld [vmem:[%s2526_s1 + $0x4] ss:$8 sps:$4 sm:$0xff] (!%p288_p2)   ;;  %v1854_v18 = vld [vmem:[%s2526_s1 + $0x170] ss:$8 sps:$4 sm:$0xff] (!%p288_p2)  }
   0xb   : > { %994 = vmatpush1.bf16.msra.mxu0 (!%p288_p2), %v1836_v3  ;;  %v1855_v19 = vld [vmem:[%s2526_s1 + $0x184] ss:$8 sps:$4 sm:$0xff] (!%p288_p2)   ;;  %950 = vmatprep.subr.bf16.mxu1 (!%p288_p2), %v1885_v17  ;;  %v1890_v20 = vld [vmem:[%s2526_s1] ss:$8 sps:$4 sm:$0xff] (!%p288_p2)   ;;  %v1891_v21 = vld [vmem:[%s2526_s1 + $0x14] ss:$8 sps:$4 sm:$0xff] (!%p288_p2)  }
   0xc   : > { %995 = vmatprep.subr.bf16.mxu0 (!%p288_p2), %v1837_v4  ;;  %951 = vmatpush1.bf16.msra.mxu1 (!%p288_p2), %v1890_v20  ;;  %v1896_v22 = vld [vmem:[%s2526_s1 + $0x10] ss:$8 sps:$4 sm:$0xff] (!%p288_p2)   ;;  %v1897_v23 = vld [vmem:[%s2526_s1 + $0x24] ss:$8 sps:$4 sm:$0xff] (!%p288_p2)   ;;  %v1857_v24 = vld [vmem:[%s2526_s1 + $0x180] ss:$8 sps:$4 sm:$0xff] (!%p288_p2)  }
   0xd   : > { %s2536_s10 = smov (!%p322_p3, %s1584_s10), 2  ;;  %952 = vmatprep.subr.bf16.mxu1 %v1891_v21  ;;  %v1858_v25 = vld [vmem:[%s2526_s1 + $0x194] ss:$8 sps:$4 sm:$0xff]   ;;  %v1902_v26 = vld [vmem:[%s2526_s1 + $0x20] ss:$8 sps:$4 sm:$0xff]   ;;  %vm946_vm0 = vcmask 130048  }
   0xe   : > { %s1819_s29 = smul.u32 56, %s2536_s10  ;;  %v1903_v27 = vld [vmem:[%s2526_s1 + $0x34] ss:$8 sps:$4 sm:$0xff]   ;;  %v1860_v28 = vld [vmem:[%s2526_s1 + $0x190] ss:$8 sps:$4 sm:$0xff]   ;;  %vm2024_vm1 = vmmov 0  }
   0xf   : > { %996 = vmatpush1.bf16.msra.mxu0 %v1839_v5  ;;  %v1861_v29 = vld [vmem:[%s2526_s1 + $0x1a4] ss:$8 sps:$4 sm:$0xff]   ;;  %v1908_v30 = vld [vmem:[%s2526_s1 + $0x30] ss:$8 sps:$4 sm:$0xff]   ;;  %v1863_v32 = vld [vmem:[%s2526_s1 + $0x1a0] ss:$8 sps:$4 sm:$0xff]  }
  0x10   : > { %997 = vmatprep.subr.bf16.mxu0 %v1840_v6  ;;  %s2122_s17 = scalar_lea.vmem %s2525_s0, %s1819_s29  ;;  %953 = vmatpush1.bf16.msra.mxu1 %v1896_v22  ;;  %v1909_v31 = vld [vmem:[%s2526_s1 + $0x44] ss:$8 sps:$4 sm:$0xff]   ;;  %v1864_v33 = vld [vmem:[%s2526_s1 + $0x1b4] ss:$8 sps:$4 sm:$0xff]   ;;  %v1914_v34 = vld [vmem:[%s2526_s1 + $0x40] ss:$8 sps:$4 sm:$0xff]  }
  0x11   : > { %v335_v13 = vld [vmem:[%s2122_s17 + $0x18] sm:$0xff]  ;;  %954 = vmatprep.subr.bf16.mxu1 %v1897_v23  ;;  %v1867_v37 = vld [vmem:[%s2526_s1 + $0x1c4] ss:$8 sps:$4 sm:$0xff]   ;;  %v1869_v40 = vld [vmem:[%s2526_s1 + $0x1c0] ss:$8 sps:$4 sm:$0xff]   ;;  %s1590_s27 = sshll.u32 %s2536_s10, 2 }
  0x12   : > { %v342_v14 = vpack.c.bf16 %v335_v13, %v335_v13  ;;  %v1915_v35 = vld [vmem:[%s2526_s1 + $0x54] ss:$8 sps:$4 sm:$0xff]   ;;  %v1866_v36 = vld [vmem:[%s2526_s1 + $0x1b0] ss:$8 sps:$4 sm:$0xff]   ;;  %v1921_v39 = vld [vmem:[%s2526_s1 + $0x64] ss:$8 sps:$4 sm:$0xff]   ;;  %s330_s11 = scalar_lea.vmem %s2534_s9, %s1590_s27 }
  0x13   : > { %998 = vmatpush1.bf16.msra.mxu0 %v1842_v7  ;;  %v1920_v38 = vld [vmem:[%s2526_s1 + $0x50] ss:$8 sps:$4 sm:$0xff]   ;;  %v1870_v41 = vld [vmem:[%s2526_s1 + $0x1d4] ss:$8 sps:$4 sm:$0xff]   ;;  %v1926_v42 = vld [vmem:[%s2526_s1 + $0x60] ss:$8 sps:$4 sm:$0xff]  }
  0x14   : > { %999 = vmatprep.subr.bf16.mxu0 %v1843_v8  ;;  %1023 = vmatprep.mubr.bf16.mxu0 %v342_v14  ;;  %v1927_v43 = vld [vmem:[%s2526_s1 + $0x74] ss:$8 sps:$4 sm:$0xff]   ;;  %v1872_v44 = vld [vmem:[%s2526_s1 + $0x1d0] ss:$8 sps:$4 sm:$0xff]   ;;  %v1873_v45 = vld [vmem:[%s2526_s1 + $0x1e4] ss:$8 sps:$4 sm:$0xff]  }
  0x15   : > { %955 = vmatpush1.bf16.msra.mxu1 %v1902_v26  ;;  %v1932_v46 = vld [vmem:[%s2526_s1 + $0x70] ss:$8 sps:$4 sm:$0xff]   ;;  %v1933_v47 = vld [vmem:[%s2526_s1 + $0x84] ss:$8 sps:$4 sm:$0xff]   ;;  %v1875_v48 = vld [vmem:[%s2526_s1 + $0x1e0] ss:$8 sps:$4 sm:$0xff]  }
  0x16   : > { %956 = vmatprep.subr.bf16.mxu1 %v1903_v27  ;;  %v1876_v49 = vld [vmem:[%s2526_s1 + $0x1f4] ss:$8 sps:$4 sm:$0xff]   ;;  %v1938_v50 = vld [vmem:[%s2526_s1 + $0x80] ss:$8 sps:$4 sm:$0xff]   ;;  %v1878_v51 = vld [vmem:[%s2526_s1 + $0x1f0] ss:$8 sps:$4 sm:$0xff]  }
  0x17   : > { %1000 = vmatpush1.bf16.msra.mxu0 %v1845_v9  ;;  %v1939_v52 = vld [vmem:[%s2526_s1 + $0x94] ss:$8 sps:$4 sm:$0xff]   ;;  %v1881_v54 = vld [vmem:[%s2526_s1 + $0x204] ss:$8 sps:$4 sm:$0xff]   ;;  %v1944_v55 = vld [vmem:[%s2526_s1 + $0x90] ss:$8 sps:$4 sm:$0xff]  }
  0x18   : > { %1001 = vmatprep.subr.bf16.mxu0 %v1846_v10  ;;  %v334_v53 = vld [vmem:[%s2122_s17 + $0x10] sm:$0xff]  ;;  %v1945_v56 = vld [vmem:[%s2526_s1 + $0xa4] ss:$8 sps:$4 sm:$0xff]   ;;  %v1879_v59 = vld [vmem:[%s2526_s1 + $0x200] ss:$8 sps:$4 sm:$0xff]  }
  0x19   : > { %957 = vmatpush1.bf16.msra.mxu1 %v1908_v30  ;;  %v341_v57 = vpack.c.bf16 %v334_v53, %v334_v53  ;;  %v337_v58 = vld [vmem:[%s2122_s17 + $0x28] sm:$0xff]  ;;  %v1884_v61 = vld [vmem:[%s2526_s1 + $0x214] ss:$8 sps:$4 sm:$0xff]   ;;  %v1882_v1 = vld [vmem:[%s2526_s1 + $0x210] ss:$8 sps:$4 sm:$0xff]  }
  0x1a   : > { %958 = vmatprep.subr.bf16.mxu1 %v1909_v31  ;;  %v344_v60 = vpack.c.bf16 %v337_v58, %v337_v58  ;;  %v1950_v62 = vld [vmem:[%s2526_s1 + $0xa0] ss:$8 sps:$4 sm:$0xff]   ;;  %v1951_v63 = vld [vmem:[%s2526_s1 + $0xb4] ss:$8 sps:$4 sm:$0xff]   ;;  %v1889_v3 = vld [vmem:[%s2526_s1 + $0x224] ss:$8 sps:$4 sm:$0xff]  }
  0x1b   : > { %1002 = vmatpush1.bf16.msra.mxu0 %v1848_v11  ;;  %v333_v0 = vld [vmem:[%s2122_s17 + $0x8] sm:$0xff]  ;;  %v1956_v4 = vld [vmem:[%s2526_s1 + $0xb0] ss:$8 sps:$4 sm:$0xff]   ;;  %v1895_v7 = vld [vmem:[%s2526_s1 + $0x234] ss:$8 sps:$4 sm:$0xff]  }
  0x1c   : > { %1003 = vmatprep.subr.bf16.mxu0 %v1849_v12  ;;  %v340_v2 = vpack.c.bf16 %v333_v0, %v333_v0  ;;  %v1957_v5 = vld [vmem:[%s2526_s1 + $0xc4] ss:$8 sps:$4 sm:$0xff]   ;;  %v1887_v6 = vld [vmem:[%s2526_s1 + $0x220] ss:$8 sps:$4 sm:$0xff]   ;;  %v1963_v9 = vld [vmem:[%s2526_s1 + $0xd4] ss:$8 sps:$4 sm:$0xff]  }
  0x1d   : > { %959 = vmatpush1.bf16.msra.mxu1 %v1914_v34  ;;  %v1962_v8 = vld [vmem:[%s2526_s1 + $0xc0] ss:$8 sps:$4 sm:$0xff]   ;;  %v1893_v10 = vld [vmem:[%s2526_s1 + $0x230] ss:$8 sps:$4 sm:$0xff]   ;;  %v1901_v11 = vld [vmem:[%s2526_s1 + $0x244] ss:$8 sps:$4 sm:$0xff]  }
  0x1e   : > { %960 = vmatprep.subr.bf16.mxu1 %v1915_v35  ;;  %982 = vmatprep.mubr.bf16.mxu1 %v340_v2  ;;  %v1899_v12 = vld [vmem:[%s2526_s1 + $0x240] ss:$8 sps:$4 sm:$0xff]   ;;  %v1968_v13 = vld [vmem:[%s2526_s1 + $0xd0] ss:$8 sps:$4 sm:$0xff]   ;;  %v1969_v14 = vld [vmem:[%s2526_s1 + $0xe4] ss:$8 sps:$4 sm:$0xff]  }
  0x1f   : > { %1004 = vmatpush1.bf16.msra.mxu0 %v1851_v15  ;;  %v1907_v15 = vld [vmem:[%s2526_s1 + $0x254] ss:$8 sps:$4 sm:$0xff]   ;;  %v1977_v20 = vld [vmem:[%s2526_s1 + $0xf0] ss:$8 sps:$4 sm:$0xff]   ;;  %v332_v21 = vld [vmem:[%s2122_s17] sm:$0xff] }
  0x20   : > { %1005 = vmatprep.subr.bf16.mxu0 %v1852_v16  ;;  %v1974_v16 = vld [vmem:[%s2526_s1 + $0xe0] ss:$8 sps:$4 sm:$0xff]   ;;  %v1975_v17 = vld [vmem:[%s2526_s1 + $0xf4] ss:$8 sps:$4 sm:$0xff]   ;;  %v339_v26 = vpack.c.bf16 %v332_v21, %v332_v21  ;;  %v1973_v53 = vld [vmem:[%s2526_s1 + $0x304] ss:$8 sps:$4 sm:$0xff]  }
  0x21   : > { %961 = vmatpush1.bf16.msra.mxu1 %v1920_v38  ;;  %v1978_v22 = vld [vmem:[%s2528_s3 + $0x40] sm:$0xff]   ;;  %v1980_v27 = vld [vmem:[%s2528_s3 + $0x48] sm:$0xff]   ;;  %v1982_v31 = vld [vmem:[%s2528_s3 + $0x50] sm:$0xff]  }
  0x22   : > { %962 = vmatprep.subr.bf16.mxu1 %v1921_v39  ;;  %v1911_v23 = vld [vmem:[%s2526_s1 + $0x260] ss:$8 sps:$4 sm:$0xff]   ;;  %v1983_v34 = vld [vmem:[%s2528_s3 + $0x10] sm:$0xff]   ;;  %v1984_v35 = vld [vmem:[%s2528_s3 + $0x58] sm:$0xff]  }
  0x23   : > { %1006 = vmatpush1.bf16.msra.mxu0 %v1854_v18  ;;  %v1905_v18 = vld [vmem:[%s2526_s1 + $0x250] ss:$8 sps:$4 sm:$0xff]   ;;  %v1981_v30 = vld [vmem:[%s2528_s3 + $0x8] sm:$0xff]   ;;  %v1986_v39 = vld [vmem:[%s2528_s3 + $0x60] sm:$0xff]  }
  0x24   : > { %1007 = vmatprep.subr.bf16.mxu0 %v1855_v19  ;;  %v1913_v19 = vld [vmem:[%s2526_s1 + $0x264] ss:$8 sps:$4 sm:$0xff]   ;;  %v1985_v38 = vld [vmem:[%s2528_s3 + $0x18] sm:$0xff]  }
  0x25   : > { %963 = vmatpush1.bf16.msra.mxu1 %v1926_v42  ;;  %v1987_v42 = vld [vmem:[%s2528_s3 + $0x20] sm:$0xff]   ;;  %v1993_v0 = vld [vmem:[%s2528_s3 + $0x38] sm:$0xff]  }
  0x26   : > { %964 = vmatprep.subr.bf16.mxu1 %v1927_v43  ;;  %v1941_v43 = vld [vmem:[%s2526_s1 + $0x2b0] ss:$8 sps:$4 sm:$0xff]  }
  0x27   : > { %1008 = vmatpush1.bf16.msra.mxu0 %v1857_v24  ;;  %v1919_v24 = vld [vmem:[%s2526_s1 + $0x274] ss:$8 sps:$4 sm:$0xff]  }
  0x28   : > { %1009 = vmatprep.subr.bf16.mxu0 %v1858_v25  ;;  %v1979_v25 = vld [vmem:[%s2528_s3] sm:$0xff]  }
  0x29   : > { %965 = vmatpush1.bf16.msra.mxu1 %v1932_v46  ;;  %v1955_v46 = vld [vmem:[%s2526_s1 + $0x2d4] ss:$8 sps:$4 sm:$0xff]  }
  0x2a   : > { %966 = vmatprep.subr.bf16.mxu1 %v1933_v47  ;;  %v1953_v47 = vld [vmem:[%s2526_s1 + $0x2d0] ss:$8 sps:$4 sm:$0xff]  }
  0x2b   : > { %1010 = vmatpush1.bf16.msra.mxu0 %v1860_v28  ;;  %v1917_v28 = vld [vmem:[%s2526_s1 + $0x270] ss:$8 sps:$4 sm:$0xff]  }
  0x2c   : > { %1011 = vmatprep.subr.bf16.mxu0 %v1861_v29  ;;  %v1925_v29 = vld [vmem:[%s2526_s1 + $0x284] ss:$8 sps:$4 sm:$0xff]  }
  0x2d   : > { %967 = vmatpush1.bf16.msra.mxu1 %v1938_v50  ;;  %v1967_v50 = vld [vmem:[%s2526_s1 + $0x2f4] ss:$8 sps:$4 sm:$0xff]  }
  0x2e   : > { %968 = vmatprep.subr.bf16.mxu1 %v1939_v52  ;;  %v336_v52 = vld [vmem:[%s2122_s17 + $0x20] sm:$0xff] }
  0x2f   : > { %1012 = vmatpush1.bf16.msra.mxu0 %v1863_v32  ;;  %v1923_v32 = vld [vmem:[%s2526_s1 + $0x280] ss:$8 sps:$4 sm:$0xff]  }
  0x30   : > { %1013 = vmatprep.subr.bf16.mxu0 %v1864_v33  ;;  %v1931_v33 = vld [vmem:[%s2526_s1 + $0x294] ss:$8 sps:$4 sm:$0xff]  }
  0x31   : > { %969 = vmatpush1.bf16.msra.mxu1 %v1944_v55  ;;  %v1971_v55 = vld [vmem:[%s2526_s1 + $0x300] ss:$8 sps:$4 sm:$0xff]  }
  0x32   : > { %970 = vmatprep.subr.bf16.mxu1 %v1945_v56  ;;  %v2022_v56 = vmov 0  }
  0x33   : > { %1014 = vmatpush1.bf16.msra.mxu0 %v1866_v36  ;;  %v1929_v36 = vld [vmem:[%s2526_s1 + $0x290] ss:$8 sps:$4 sm:$0xff]  }
  0x34   : > { %1015 = vmatprep.subr.bf16.mxu0 %v1867_v37  ;;  %v1937_v37 = vld [vmem:[%s2526_s1 + $0x2a4] ss:$8 sps:$4 sm:$0xff]  }
  0x35   : > { %971 = vmatpush1.bf16.msra.mxu1 %v1950_v62  ;;  %v1991_v62 = vld [vmem:[%s2528_s3 + $0x30] sm:$0xff]  }
  0x36   : > { %972 = vmatprep.subr.bf16.mxu1 %v1951_v63  ;;  %v1992_v63 = vld [vmem:[%s2528_s3 + $0x78] sm:$0xff]  }
  0x37   : > { %1016 = vmatpush1.bf16.msra.mxu0 %v1869_v40  ;;  %v1935_v40 = vld [vmem:[%s2526_s1 + $0x2a0] ss:$8 sps:$4 sm:$0xff]  }
  0x38   : > { %1017 = vmatprep.subr.bf16.mxu0 %v1870_v41  ;;  %v1943_v41 = vld [vmem:[%s2526_s1 + $0x2b4] ss:$8 sps:$4 sm:$0xff]  }
  0x39   : > { %973 = vmatpush1.bf16.msra.mxu1 %v1956_v4 }
  0x3a   : > { %974 = vmatprep.subr.bf16.mxu1 %v1957_v5 }
  0x3b   : > { %1018 = vmatpush1.bf16.msra.mxu0 %v1872_v44  ;;  %v1949_v44 = vld [vmem:[%s2526_s1 + $0x2c4] ss:$8 sps:$4 sm:$0xff]  }
  0x3c   : > { %1019 = vmatprep.subr.bf16.mxu0 %v1873_v45  ;;  %v1947_v45 = vld [vmem:[%s2526_s1 + $0x2c0] ss:$8 sps:$4 sm:$0xff]  }
  0x3d   : > { %975 = vmatpush1.bf16.msra.mxu1 %v1962_v8 }
  0x3e   : > { %976 = vmatprep.subr.bf16.mxu1 %v1963_v9  ;;  %v444_v9 = vld [vmem:[%s2527_s2] sm:$0x3] }
  0x3f   : > { %1020 = vmatpush1.bf16.msra.mxu0 %v1875_v48  ;;  %v1961_v48 = vld [vmem:[%s2526_s1 + $0x2e4] ss:$8 sps:$4 sm:$0xff]  }
  0x40   : > { %1021 = vmatprep.subr.bf16.mxu0 %v1876_v49  ;;  %v1959_v49 = vld [vmem:[%s2526_s1 + $0x2e0] ss:$8 sps:$4 sm:$0xff]  }
  0x41   : > { %977 = vmatpush1.bf16.msra.mxu1 %v1968_v13 }
  0x42   : > { %978 = vmatprep.subr.bf16.mxu1 %v1969_v14 }
  0x43   : > { %1022 = vmatpush1.bf16.msra.mxu0 %v1878_v51  ;;  %v1965_v51 = vld [vmem:[%s2526_s1 + $0x2f0] ss:$8 sps:$4 sm:$0xff]  }
  0x44   : > { %1032 = vmatprep.subr.bf16.mxu0 %v1881_v54  ;;  %v343_v54 = vpack.c.bf16 %v336_v52, %v336_v52 }
  0x45   : > { %979 = vmatpush1.bf16.msra.mxu1 %v1974_v16 }
  0x46   : > { %1024 = vmatmul.mubr.bf16.vlgmr.msra.gmra.mrb[0].mxu0 %v341_v57  ;;  %980 = vmatprep.subr.bf16.mxu1 %v1975_v17  ;;  %v338_v57 = vld [vmem:[%s2122_s17 + $0x30] sm:$0xff] }
  0x47   : > { %1033 = vmatpush1.bf16.msra.mxu0 %v1879_v59  ;;  %1064 = vmatprep.mubr.bf16.mxu0 %v344_v60  ;;  %v345_v58 = vpack.c.bf16 %v338_v57, %v338_v57  ;;  %v1988_v59 = vld [vmem:[%s2528_s3 + $0x68] sm:$0xff]  }
  0x48   : > { %1034 = vmatprep.subr.bf16.mxu0 %v1884_v61  ;;  %v1989_v60 = vld [vmem:[%s2528_s3 + $0x28] sm:$0xff]   ;;  %v1990_v61 = vld [vmem:[%s2528_s3 + $0x70] sm:$0xff]  }
  0x49   : > { %981 = vmatpush1.bf16.msra.mxu1 %v1977_v20 }
  0x4a   : > { %1727 = vmatprep.subr.bf16.mxu1 %v1978_v22 }
  0x4b   : > { %1035 = vmatpush1.bf16.msra.mxu0 %v1882_v1  ;;  %v2023_v1 = vmov 0.0  }
  0x4c   : > { %1036 = vmatprep.subr.bf16.mxu0 %v1889_v3  ;;  %983 = vmatmul.mubr.bf16.vlgmr.msra.gmra.mrb[0].mxu1 %v339_v26  ;;  %v1995_v26 = vld [vmem:[%s2530_s5 + $0x8] sm:$0xff]  }
  0x4d   : > { %1728 = vmatpush3.bf16.msra.mxu1 %v1979_v25 }
  0x4e   : > { %1729 = vmatprep.subr.bf16.mxu1 %v1980_v27  ;;  %v1996_v27 = vld [vmem:[%s2530_s5 + $0x10] sm:$0xff]  }
  0x4f   : > { %1037 = vmatpush1.bf16.msra.mxu0 %v1887_v6  ;;  %v446_v6 = vlaneseq }
  0x50   : > { %1038 = vmatprep.subr.bf16.mxu0 %v1895_v7 }
  0x51   : > { %1730 = vmatpush3.bf16.msra.mxu1 %v1981_v30  ;;  %v447_v7 = vshrl.u32 %v446_v6, 7  ;;  %v1999_v30 = vld [vmem:[%s2530_s5 + $0x28] sm:$0xff]  }
  0x52   : > { %1731 = vmatprep.subr.bf16.mxu1 %v1982_v31  ;;  %v2000_v31 = vld [vmem:[%s2530_s5 + $0x30] sm:$0xff]  }
  0x53   : > { %1039 = vmatpush1.bf16.msra.mxu0 %v1893_v10  ;;  %v448_v8 = vsub.s32 0, %v447_v7  ;;  %v452_v10 = vsub.s32 1, %v447_v7 }
  0x54   : > { %1040 = vmatprep.subr.bf16.mxu0 %v1901_v11 }
  0x55   : > { %1732 = vmatpush3.bf16.msra.mxu1 %v1983_v34  ;;  %v449_v11 = vrot.slane %v444_v9, %v448_v8  ;;  %v1690_v34 = vld [vmem:[%s2529_s4] ss:$0 sm:$0xff] }
  0x56   : > { %1733 = vmatprep.subr.bf16.mxu1 %v1984_v35 }
  0x57   : > { %1041 = vmatpush1.bf16.msra.mxu0 %v1899_v12  ;;  %v453_v12 = vrot.slane %v444_v9, %v452_v10 }
  0x58   : > { %1042 = vmatprep.subr.bf16.mxu0 %v1907_v15 }
  0x59   : > { %1734 = vmatpush3.bf16.msra.mxu1 %v1985_v38 }
  0x5a   : > { %1735 = vmatprep.subr.bf16.mxu1 %v1986_v39 }
  0x5b   : > { %1043 = vmatpush1.bf16.msra.mxu0 %v1905_v18 }
  0x5c   : > { %1044 = vmatprep.subr.bf16.mxu0 %v1913_v19 }
  0x5d   : > { %1736 = vmatpush3.bf16.msra.mxu1 %v1987_v42 }
  0x5e   : > { %1737 = vmatprep.subr.bf16.mxu1 %v1988_v59 }
  0x5f   : > { %1045 = vmatpush1.bf16.msra.mxu0 %v1911_v23 }
  0x60   : > { %1046 = vmatprep.subr.bf16.mxu0 %v1919_v24  ;;  %v1994_v24 = vld [vmem:[%s2530_s5] sm:$0xff]  }
  0x61   : > { %1738 = vmatpush3.bf16.msra.mxu1 %v1989_v60 }
  0x62   : > { %1739 = vmatprep.subr.bf16.mxu1 %v1990_v61 }
  0x63   : > { %1047 = vmatpush1.bf16.msra.mxu0 %v1917_v28  ;;  %v1997_v28 = vld [vmem:[%s2530_s5 + $0x18] sm:$0xff]  }
  0x64   : > { %1048 = vmatprep.subr.bf16.mxu0 %v1925_v29  ;;  %v1998_v29 = vld [vmem:[%s2530_s5 + $0x20] sm:$0xff]  }
  0x65   : > { %1740 = vmatpush3.bf16.msra.mxu1 %v1991_v62 }
  0x66   : > { %1741 = vmatprep.subr.bf16.mxu1 %v1992_v63 }
  0x67   : > { %1049 = vmatpush1.bf16.msra.mxu0 %v1923_v32  ;;  %v2001_v32 = vld [vmem:[%s2530_s5 + $0x38] sm:$0xff]  }
  0x68   : > { %1050 = vmatprep.subr.bf16.mxu0 %v1931_v33 }
  0x69   : > { %1742 = vmatpush3.bf16.msra.mxu1 %v1993_v0 }
  0x6a   : > { %1767 = vmatprep.subr.bf16.mxu1 %v2023_v1 }
  0x6b   : > { %1051 = vmatpush1.bf16.msra.mxu0 %v1929_v36 }
  0x6c   : > { %1052 = vmatprep.subr.bf16.mxu0 %v1937_v37 }
  0x6f   : > { %1053 = vmatpush1.bf16.msra.mxu0 %v1935_v40 }
  0x70   : > { %1054 = vmatprep.subr.bf16.mxu0 %v1943_v41  ;;  %v2002_v41 = vld [vmem:[%s2532_s7] sm:$0xff]  }
  0x73   : > { %1055 = vmatpush1.bf16.msra.mxu0 %v1941_v43  ;;  %v2003_v43 = vld [vmem:[%s2532_s7 + $0x8] sm:$0xff]  }
  0x74   : > { %1056 = vmatprep.subr.bf16.mxu0 %v1949_v44  ;;  %v2004_v44 = vld [vmem:[%s2532_s7 + $0x10] sm:$0xff]  }
  0x77   : > { %1057 = vmatpush1.bf16.msra.mxu0 %v1947_v45  ;;  %v2005_v45 = vld [vmem:[%s2532_s7 + $0x18] sm:$0xff]  }
  0x78   : > { %1058 = vmatprep.subr.bf16.mxu0 %v1955_v46  ;;  %v2006_v46 = vld [vmem:[%s2532_s7 + $0x20] sm:$0xff]  }
  0x7b   : > { %1059 = vmatpush1.bf16.msra.mxu0 %v1953_v47  ;;  %v2007_v47 = vld [vmem:[%s2532_s7 + $0x28] sm:$0xff]  }
  0x7c   : > { %1060 = vmatprep.subr.bf16.mxu0 %v1961_v48  ;;  %v2008_v48 = vld [vmem:[%s2532_s7 + $0x30] sm:$0xff]  }
  0x7f   : > { %1061 = vmatpush1.bf16.msra.mxu0 %v1959_v49  ;;  %v2009_v49 = vld [vmem:[%s2532_s7 + $0x38] sm:$0xff]  }
  0x80   : > { %1062 = vmatprep.subr.bf16.mxu0 %v1967_v50  ;;  %v1707_v50 = vld [vmem:[%s2531_s6] ss:$0 sm:$0xff] }
  0x83   : > { %1063 = vmatpush1.bf16.msra.mxu0 %v1965_v51 }
  0x84   : > { %1073 = vmatprep.subr.bf16.mxu0 %v1973_v53 }
  0x86   : > { %1065 = vmatmul.mubr.bf16.vlgmr.msra.gmra.mrb[0].mxu0 %v343_v54 }
  0x87   : > { %1074 = vmatpush1.bf16.msra.mxu0 %v1971_v55  ;;  %1105 = vmatprep.mubr.bf16.mxu0 %v2022_v56 }
  0x92   : > { %1689 = vmatmul.mubr.msk.bf16.vlgmr.msra.gmra.mrb[0].mxu0 %vm946_vm0, %v345_v58  ;;  %v1716_v58 = vld [vmem:[%s2533_s8] ss:$0 sm:$0xff] }
 0x11f   : > { %v984_v2 = vpop.f32.mrb[0].mxu1 }
 0x120   : > { %v986_v3 = vpop.f32.mrb[1].mxu1  ;;  %v985_v13 = vadd.f32 %v984_v2, %v449_v11 }
 0x121   : > { %v988_v4 = vpop.f32.mrb[2].mxu1  ;;  %v987_v14 = vadd.f32 %v986_v3, %v453_v12 }
 0x122   : > { %v989_v5 = vpop.f32.mrb[3].mxu1 }
 0x165   : > { %v1107_v15 = vpop.f32.mrb[0].mxu0 }
 0x166   : > { %v1808_v16 = vadd.f32 %v1107_v15, %v985_v13  ;;  %v1109_v17 = vpop.f32.mrb[1].mxu0 }
 0x167   : > { %v1810_v18 = vadd.f32 %v1109_v17, %v987_v14  ;;  %v1111_v19 = vpop.f32.mrb[2].mxu0 }
 0x168   : > { %v1114_v20 = vmax.f32 %v1808_v16, 0.0  ;;  %v1112_v21 = vpop.f32.mrb[3].mxu0 }
 0x169   : > { %v1115_v22 = vmax.f32 %v1810_v18, 0.0 }
 0x16a   : > { %v1116_v25 = vpack.c.bf16 %v1114_v20, %v1114_v20 }
 0x16b   : > { %v1117_v23 = vpack.c.bf16 %v1115_v22, %v1115_v22 }
 0x16d   : > { %1285 = vmatprep.mubr.bf16.mxu1 %v1117_v23 }
 0x16e   : > { %1286 = vmatmul.mubr.bf16.vlgmr.msra.gmra.mrb[4].mxu1 %v1116_v25 }
 0x16f   : > { %1768 = vmatpush3.bf16.msra.mxu1 %v1994_v24  ;;  %1783 = vmatprep.mubr.msk.bf16.mxu1 %vm2024_vm1, %v2023_v1 }
 0x170   : > { %1769 = vmatprep.subr.bf16.mxu1 %v2023_v1 }
 0x173   : > { %1770 = vmatpush3.bf16.msra.mxu1 %v1995_v26 }
 0x174   : > { %1771 = vmatprep.subr.bf16.mxu1 %v2023_v1 }
 0x177   : > { %1772 = vmatpush3.bf16.msra.mxu1 %v1996_v27 }
 0x178   : > { %1773 = vmatprep.subr.bf16.mxu1 %v2023_v1 }
 0x17b   : > { %1774 = vmatpush3.bf16.msra.mxu1 %v1997_v28 }
 0x17c   : > { %1775 = vmatprep.subr.bf16.mxu1 %v2023_v1 }
 0x17f   : > { %1776 = vmatpush3.bf16.msra.mxu1 %v1998_v29 }
 0x180   : > { %1777 = vmatprep.subr.bf16.mxu1 %v2023_v1 }
 0x183   : > { %1778 = vmatpush3.bf16.msra.mxu1 %v1999_v30 }
 0x184   : > { %1779 = vmatprep.subr.bf16.mxu1 %v2023_v1 }
 0x187   : > { %1780 = vmatpush3.bf16.msra.mxu1 %v2000_v31 }
 0x188   : > { %1781 = vmatprep.subr.bf16.mxu1 %v2023_v1 }
 0x18b   : > { %1782 = vmatpush3.bf16.msra.mxu1 %v2001_v32 }
 0x18c   : > { %1787 = vmatprep.subr.bf16.mxu1 %v2023_v1 }
 0x241   : > { %v1743_v33 = vpop.f32.mrb[4].mxu1 }
 0x242   : > { %v1744_v35 = vpop.f32.mrb[5].mxu1 }
 0x243   : > { %v1745_v36 = vadd.f32 %v1744_v35, %v1743_v33  ;;  %v1746_v37 = vpop.f32.mrb[6].mxu1 }
 0x244   : > { %v1747_v38 = vpop.f32.mrb[7].mxu1 }
 0x245   : > { %v1288_v39 = vadd.f32 %v1745_v36, %v1690_v34 }
 0x247   : > { %v1293_v40 = vmax.f32 %v1288_v39, 0.0 }
 0x249   : > { %v1294_v42 = vpack.c.bf16 %v1293_v40, %v1293_v40 }
 0x24b   : > { %1784 = vmatmul.mubr.bf16.vlgmr.msra.gmra.mrb[8].mxu1 %v1294_v42 }
 0x24c   : > { %1788 = vmatpush3.bf16.msra.mxu1 %v2002_v41  ;;  %1803 = vmatprep.mubr.msk.bf16.mxu1 %vm2024_vm1, %v2023_v1 }
 0x24d   : > { %1789 = vmatprep.subr.bf16.mxu1 %v2023_v1 }
 0x250   : > { %1790 = vmatpush3.bf16.msra.mxu1 %v2003_v43 }
 0x251   : > { %1791 = vmatprep.subr.bf16.mxu1 %v2023_v1 }
 0x254   : > { %1792 = vmatpush3.bf16.msra.mxu1 %v2004_v44 }
 0x255   : > { %1793 = vmatprep.subr.bf16.mxu1 %v2023_v1 }
 0x258   : > { %1794 = vmatpush3.bf16.msra.mxu1 %v2005_v45 }
 0x259   : > { %1795 = vmatprep.subr.bf16.mxu1 %v2023_v1 }
 0x25c   : > { %1796 = vmatpush3.bf16.msra.mxu1 %v2006_v46 }
 0x25d   : > { %1797 = vmatprep.subr.bf16.mxu1 %v2023_v1 }
 0x260   : > { %1798 = vmatpush3.bf16.msra.mxu1 %v2007_v47 }
 0x261   : > { %1799 = vmatprep.subr.bf16.mxu1 %v2023_v1 }
 0x264   : > { %1800 = vmatpush3.bf16.msra.mxu1 %v2008_v48 }
 0x265   : > { %1801 = vmatprep.subr.bf16.mxu1 %v2023_v1 }
 0x268   : > { %1802 = vmatpush3.bf16.msra.mxu1 %v2009_v49 }
 0x31e   : > { %v1400_v51 = vpop.f32.mrb[8].mxu1 }
 0x31f   : > { %v1401_v52 = vadd.f32 %v1707_v50, %v1400_v51  ;;  %v1785_v53 = vpop.f32.mrb[9].mxu1 }
 0x320   : > { %v1403_v54 = vpop.f32.mrb[10].mxu1 }
 0x321   : > { %v1406_v55 = vmax.f32 %v1401_v52, 0.0  ;;  %v1786_v56 = vpop.f32.mrb[11].mxu1 }
 0x323   : > { %v1407_v57 = vpack.c.bf16 %v1406_v55, %v1406_v55 }
 0x325   : > { %1804 = vmatmul.mubr.bf16.vlgmr.msra.gmra.mrb[12].mxu1 %v1407_v57 }
 0x3f8   : > { %v1513_v59 = vpop.f32.mrb[12].mxu1 }
 0x3f9   : > { %v1514_v60 = vadd.f32 %v1716_v58, %v1513_v59  ;;  %v1805_v61 = vpop.f32.mrb[13].mxu1 }
 0x3fa   : > { %v1516_v62 = vpop.f32.mrb[14].mxu1 }
 0x3fb   : > { %1519 = vmax.xlane.f32.xlu0 %v1514_v60  ;;  %v1806_v63 = vpop.f32.mrb[15].mxu1 }
 0x488   : > { %v1520_v0 = vpop.xlane.xlu0 %1519 }
 0x489   : > { %v1521_v1 = vsub.f32 %v1514_v60, %v1520_v0 }
 0x48b   : > { %v1522_v2 = vmul.f32 1.442695, %v1521_v1 }
 0x48d   : > { %2010 = vpow2.f32 %v1522_v2 }
 0x497   : > { %v2011_v3 = vpop.eup %2010 }
 0x498   : > { %1524 = vadd.xlane.f32.xlu0 %v2011_v3 }
 0x525   : > { %v1525_v4 = vpop.xlane.xlu0 %1524 }
 0x526   : > { %2012 = vlog2.f32 %v1525_v4 }
 0x530   : > { %v2013_v5 = vpop.eup %2012 }
 0x531   : > { %v1527_v6 = vmul.f32 0.6931472, %v2013_v5 }
 0x533   : > { %v1528_v7 = vsub.f32 %v1521_v1, %v1527_v6 }
 0x535   : > { %v1529_v8 = vpack.c.bf16 %v1528_v7, %v1528_v7 }
 0x537   : > { %1530 = vst [vmem:[%s330_s11] sm:$0xf] %v1529_v8 }
 0x538 PF: > { %s19_s30 = sadd.s32 1, %s2020_s30  }
 0x539   : > { %p16_p4 = scmp.ge.s32.totalorder %s19_s30, 5  }
 0x53b   :  { %18 = sbr.rel (!%p16_p4) target bundleno = 1 (0x1), region = 86 }

</bundles_post_ra>
